<compile_context>
chip_gen: v5e
topology: v5e:2x2
jax: 0.10.0
libtpu: 0.0.40
codegen_flags: <defaults>
</compile_context>

<pallas_src>
import jax
import jax.numpy as jnp
from jax.experimental import pallas as pl
from jax.experimental.pallas import tpu as pltpu

F_PAD = 128            # padded feature width for the MXU layers
TM_MAX = 1024          # max batch tile (sweepable: 512 / 1024 / 2048)

# true layer widths of FC2
DIMS = [97, 70, 50, 20, 5, 1]


def _round_up(x, m):
    return ((x + m - 1) // m) * m


def _tc_per_device():
    """Best-effort count of TensorCores a 'parallel' grid axis is sharded across."""
    try:
        kind = jax.devices()[0].device_kind.lower()
    except Exception:
        return 1
    # megacore (2 TCs per JAX device): v4, v5p, v7x
    return 2 if any(t in kind for t in ("v4", "v5p", "v7", "7x")) else 1


def _pick_tiling(B):
    """Return (tile, padded_batch). Single big tile on 1-TC chips; even >=2-step grid on
    megacore chips so both TensorCores get equal work."""
    b8 = _round_up(max(B, 1), 8)
    nc = _tc_per_device()
    if nc <= 1:
        tm = min(b8, TM_MAX)
        bp = _round_up(b8, tm)
    else:
        steps = nc * max(1, -(-b8 // (nc * TM_MAX)))   # smallest even step count, tm <= TM_MAX
        tm = min(_round_up(-(-b8 // steps), 8), TM_MAX)
        bp = steps * tm
    return tm, bp


def fc2_kernel(x_ref, w1_ref, w2_ref, w3_ref, w4_ref, w5_ref, o_ref, xpad_ref):
    # x_ref: (TM, 97).  w1..w4: (128, 128) bf16 with bias folded into row 127 and a
    # constant-1 at [127,127].  w5: (1, 128) f32 with b5 folded into lane 127.
    # o_ref: (TM, 1) f32.  xpad_ref: (TM, 128) bf16 VMEM scratch.
    tm = xpad_ref.shape[0]
    npad = F_PAD - DIMS[0]

    # Initialize only the pad lanes (31 of 128) every grid step; lane 127 carries the
    # constant 1 that implements the bias fold.  (Unconditional -> safe under megacore.)
    xpad_ref[:, DIMS[0]:] = jnp.zeros((tm, npad), dtype=xpad_ref.dtype)
    xpad_ref[:, F_PAD - 1:] = jnp.ones((tm, 1), dtype=xpad_ref.dtype)
    xpad_ref[:, :DIMS[0]] = x_ref[...].astype(xpad_ref.dtype)

    h = xpad_ref[...]                                   # (TM, 128) bf16, lane 127 == 1

    def dense_relu(h_bf16, w_ref):
        z = jnp.dot(h_bf16, w_ref[...], preferred_element_type=jnp.float32)
        return jnp.maximum(z, 0.0).astype(jnp.bfloat16)  # fused ReLU + cast, bf16 activations

    h = dense_relu(h, w1_ref)        # fc1 + relu
    h = dense_relu(h, w2_ref)        # fc2 + relu
    h = dense_relu(h, w3_ref)        # fc3 + relu   (dropout3 == identity in eval)
    # fc4 + relu (dropout4 == identity); stays f32 since it feeds the VPU fc5 reduction.
    h4 = jnp.maximum(jnp.dot(h, w4_ref[...], preferred_element_type=jnp.float32), 0.0)

    # fc5: effective 128->1 on the VPU + cross-lane reduce; b5 lives in w5 lane 127
    # (multiplied by the constant-1 lane of h4).
    z = jnp.sum(h4 * w5_ref[...], axis=-1, keepdims=True)
    o_ref[...] = jax.nn.sigmoid(z).astype(o_ref.dtype)


def prepare_params(params):
    """Pad / transpose PyTorch-layout params ONCE (reused across forward calls).
    params: list of (w, b), w: (out, in), b: (out,).  Biases are folded into the weights."""
    flat = []
    for li in range(4):
        w, b = params[li]
        in_d, out_d = DIMS[li], DIMS[li + 1]
        wt = jnp.asarray(w, jnp.float32).T                        # (in, out)
        wp = jnp.zeros((F_PAD, F_PAD), dtype=jnp.float32)
        wp = wp.at[:in_d, :out_d].set(wt)
        wp = wp.at[F_PAD - 1, :out_d].set(jnp.asarray(b, jnp.float32))  # bias row
        wp = wp.at[F_PAD - 1, F_PAD - 1].set(1.0)                 # propagate constant-1 lane
        flat.append(wp.astype(jnp.bfloat16))                     # bf16 MXU operand
    w5, b5 = params[4]
    w5v = jnp.zeros((1, F_PAD), dtype=jnp.float32)
    w5v = w5v.at[0, :DIMS[4]].set(jnp.asarray(w5, jnp.float32).reshape(-1))
    w5v = w5v.at[0, F_PAD - 1].set(jnp.asarray(b5, jnp.float32).reshape(())[()])  # fold b5
    flat.append(w5v)
    return flat


def fc2_forward(x, prepared):
    """x: (B, 97) float (f32 or bf16). prepared: output of prepare_params. Returns (B, 1) f32."""
    B, Fin = x.shape
    assert Fin == DIMS[0]

    tm, Bp = _pick_tiling(B)
    xp = x
    if Bp != B:
        xp = jnp.pad(xp, ((0, Bp - B), (0, 0)))   # batch-only pad (feature axis untouched)

    grid = (Bp // tm,)
    w_spec = pl.BlockSpec((F_PAD, F_PAD), lambda i: (0, 0))
    in_specs = [pl.BlockSpec((tm, DIMS[0]), lambda i: (i, 0))]   # x: natural 97-wide last dim
    in_specs += [w_spec] * 4
    in_specs += [pl.BlockSpec((1, F_PAD), lambda i: (0, 0))]     # fc5 row vector (b5 folded)

    out = pl.pallas_call(
        fc2_kernel,
        out_shape=jax.ShapeDtypeStruct((Bp, 1), jnp.float32),
        grid_spec=pltpu.PrefetchScalarGridSpec(
            num_scalar_prefetch=0,
            grid=grid,
            in_specs=in_specs,
            out_specs=pl.BlockSpec((tm, 1), lambda i: (i, 0)),
            scratch_shapes=[pltpu.VMEM((tm, F_PAD), jnp.bfloat16)],
        ),
        compiler_params=pltpu.CompilerParams(
            dimension_semantics=("parallel",)),
    )(xp, *prepared)

    return out[:B]


def fc2_reference(x, params):
    h = x.astype(jnp.float32)
    for li, (w, b) in enumerate(params):
        h = h @ w.T + b
        if li < 4:
            h = jnp.maximum(h, 0.0)
    return jax.nn.sigmoid(h)


def init_params(key):
    params = []
    for li in range(5):
        in_d, out_d = DIMS[li], DIMS[li + 1]
        key, kw, kb = jax.random.split(key, 3)
        bound = 1.0 / jnp.sqrt(in_d)
        w = jax.random.uniform(kw, (out_d, in_d), jnp.float32, -bound, bound)
        b = jax.random.uniform(kb, (out_d,), jnp.float32, -bound, bound)
        params.append((w, b))
    return params


if __name__ == "__main__":
    key = jax.random.PRNGKey(0)
    key, kx = jax.random.split(key)
    B = 16
    x = jax.random.normal(kx, (B, 97), dtype=jnp.float32)
    params = init_params(key)

    prepared = prepare_params(params)     # padded/transposed/bias-folded once, reused across calls
    y = fc2_forward(x, prepared)
    y = jax.block_until_ready(y)

    y_ref = fc2_reference(x, params)
    assert y.shape == (B, 1)
    # bf16 MXU operands + bf16-folded biases (f32 accumulation) -> relaxed tolerance vs f32 ref
    assert jnp.allclose(y, y_ref, atol=2e-2, rtol=2e-2), "mismatch vs reference"
    print("KERNEL_OK")
</pallas_src>

<mosaic_0001>
module attributes {stable_mosaic.version = 11 : i64} {
  func.func @fc2_kernel(%arg0: i32, %arg1: memref<16x97xf32, #tpu.memory_space<vmem>>, %arg2: memref<128x128xbf16, #tpu.memory_space<vmem>>, %arg3: memref<128x128xbf16, #tpu.memory_space<vmem>>, %arg4: memref<128x128xbf16, #tpu.memory_space<vmem>>, %arg5: memref<128x128xbf16, #tpu.memory_space<vmem>>, %arg6: memref<1x128xf32, #tpu.memory_space<vmem>>, %arg7: memref<16x1xf32, #tpu.memory_space<vmem>>, %arg8: memref<16x128xbf16, #tpu.memory_space<vmem>>) attributes {dimension_semantics = [#tpu.dimension_semantics<parallel>], iteration_bounds = array<i64: 1>, scalar_prefetch = 0 : i64, scratch_operands = 1 : i64, tpu.core_type = #tpu.core_type<tc>, window_params = [{transform_indices = @transform_0, window_bounds = array<i64: 16, 97>}, {pipeline_mode = #tpu.pipeline_mode<synchronous>, transform_indices = @transform_1, window_bounds = array<i64: 128, 128>}, {pipeline_mode = #tpu.pipeline_mode<synchronous>, transform_indices = @transform_2, window_bounds = array<i64: 128, 128>}, {pipeline_mode = #tpu.pipeline_mode<synchronous>, transform_indices = @transform_3, window_bounds = array<i64: 128, 128>}, {pipeline_mode = #tpu.pipeline_mode<synchronous>, transform_indices = @transform_4, window_bounds = array<i64: 128, 128>}, {pipeline_mode = #tpu.pipeline_mode<synchronous>, transform_indices = @transform_5, window_bounds = array<i64: 1, 128>}, {transform_indices = @transform_6, window_bounds = array<i64: 16, 1>}]} {
    %cst = arith.constant 0.000000e+00 : bf16
    %0 = vector.broadcast %cst : bf16 to vector<16x31xbf16>
    %c0 = arith.constant 0 : index
    %c97 = arith.constant 97 : index
    %1 = vector.load %arg8[%c0, %c97] : memref<16x128xbf16, #tpu.memory_space<vmem>>, vector<16x31xbf16>
    tpu.vector_store %arg8[%c0, %c97], %0 {strides = array<i32>} : memref<16x128xbf16, #tpu.memory_space<vmem>>, vector<16x31xbf16>,
    %cst_0 = arith.constant 1.000000e+00 : bf16
    %2 = vector.broadcast %cst_0 : bf16 to vector<16x1xbf16>
    %c0_1 = arith.constant 0 : index
    %c127 = arith.constant 127 : index
    %3 = vector.load %arg8[%c0_1, %c127] : memref<16x128xbf16, #tpu.memory_space<vmem>>, vector<16x1xbf16>
    tpu.vector_store %arg8[%c0_1, %c127], %2 {strides = array<i32>} : memref<16x128xbf16, #tpu.memory_space<vmem>>, vector<16x1xbf16>,
    %c0_2 = arith.constant 0 : index
    %c0_3 = arith.constant 0 : index
    %4 = vector.load %arg1[%c0_2, %c0_3] : memref<16x97xf32, #tpu.memory_space<vmem>>, vector<16x97xf32>
    %5 = arith.truncf %4 : vector<16x97xf32> to vector<16x97xbf16>
    %c0_4 = arith.constant 0 : index
    %c0_5 = arith.constant 0 : index
    %6 = vector.load %arg8[%c0_4, %c0_5] : memref<16x128xbf16, #tpu.memory_space<vmem>>, vector<16x97xbf16>
    tpu.vector_store %arg8[%c0_4, %c0_5], %5 {strides = array<i32>} : memref<16x128xbf16, #tpu.memory_space<vmem>>, vector<16x97xbf16>,
    %c0_6 = arith.constant 0 : index
    %c0_7 = arith.constant 0 : index
    %7 = vector.load %arg8[%c0_6, %c0_7] : memref<16x128xbf16, #tpu.memory_space<vmem>>, vector<16x128xbf16>
    %c0_8 = arith.constant 0 : index
    %c0_9 = arith.constant 0 : index
    %8 = vector.load %arg2[%c0_8, %c0_9] : memref<128x128xbf16, #tpu.memory_space<vmem>>, vector<128x128xbf16>
    %cst_10 = arith.constant dense<0.000000e+00> : vector<16x128xf32>
    %9 = tpu.matmul %7, %8, %cst_10 {dimension_numbers = #tpu.dot_dimension_numbers<[1], [0], [0], [1], [0, 0, 1, 1], [], []>} : vector<16x128xbf16>, vector<128x128xbf16>, vector<16x128xf32> -> vector<16x128xf32>
    %cst_11 = arith.constant 0.000000e+00 : f32
    %10 = vector.broadcast %cst_11 : f32 to vector<16x128xf32>
    %11 = arith.maximumf %9, %10 : vector<16x128xf32>
    %12 = arith.truncf %11 : vector<16x128xf32> to vector<16x128xbf16>
    %c0_12 = arith.constant 0 : index
    %c0_13 = arith.constant 0 : index
    %13 = vector.load %arg3[%c0_12, %c0_13] : memref<128x128xbf16, #tpu.memory_space<vmem>>, vector<128x128xbf16>
    %cst_14 = arith.constant dense<0.000000e+00> : vector<16x128xf32>
    %14 = tpu.matmul %12, %13, %cst_14 {dimension_numbers = #tpu.dot_dimension_numbers<[1], [0], [0], [1], [0, 0, 1, 1], [], []>} : vector<16x128xbf16>, vector<128x128xbf16>, vector<16x128xf32> -> vector<16x128xf32>
    %cst_15 = arith.constant 0.000000e+00 : f32
    %15 = vector.broadcast %cst_15 : f32 to vector<16x128xf32>
    %16 = arith.maximumf %14, %15 : vector<16x128xf32>
    %17 = arith.truncf %16 : vector<16x128xf32> to vector<16x128xbf16>
    %c0_16 = arith.constant 0 : index
    %c0_17 = arith.constant 0 : index
    %18 = vector.load %arg4[%c0_16, %c0_17] : memref<128x128xbf16, #tpu.memory_space<vmem>>, vector<128x128xbf16>
    %cst_18 = arith.constant dense<0.000000e+00> : vector<16x128xf32>
    %19 = tpu.matmul %17, %18, %cst_18 {dimension_numbers = #tpu.dot_dimension_numbers<[1], [0], [0], [1], [0, 0, 1, 1], [], []>} : vector<16x128xbf16>, vector<128x128xbf16>, vector<16x128xf32> -> vector<16x128xf32>
    %cst_19 = arith.constant 0.000000e+00 : f32
    %20 = vector.broadcast %cst_19 : f32 to vector<16x128xf32>
    %21 = arith.maximumf %19, %20 : vector<16x128xf32>
    %22 = arith.truncf %21 : vector<16x128xf32> to vector<16x128xbf16>
    %c0_20 = arith.constant 0 : index
    %c0_21 = arith.constant 0 : index
    %23 = vector.load %arg5[%c0_20, %c0_21] : memref<128x128xbf16, #tpu.memory_space<vmem>>, vector<128x128xbf16>
    %cst_22 = arith.constant dense<0.000000e+00> : vector<16x128xf32>
    %24 = tpu.matmul %22, %23, %cst_22 {dimension_numbers = #tpu.dot_dimension_numbers<[1], [0], [0], [1], [0, 0, 1, 1], [], []>} : vector<16x128xbf16>, vector<128x128xbf16>, vector<16x128xf32> -> vector<16x128xf32>
    %cst_23 = arith.constant 0.000000e+00 : f32
    %25 = vector.broadcast %cst_23 : f32 to vector<16x128xf32>
    %26 = arith.maximumf %24, %25 : vector<16x128xf32>
    %c0_24 = arith.constant 0 : index
    %c0_25 = arith.constant 0 : index
    %27 = vector.load %arg6[%c0_24, %c0_25] : memref<1x128xf32, #tpu.memory_space<vmem>>, vector<1x128xf32>
    %28 = vector.broadcast %27 : vector<1x128xf32> to vector<16x128xf32>
    %29 = arith.mulf %26, %28 : vector<16x128xf32>
    %cst_26 = arith.constant dense<0.000000e+00> : vector<16xf32>
    %30 = vector.multi_reduction <add>, %29, %cst_26 [1] : vector<16x128xf32> to vector<16xf32>
    %31 = vector.shape_cast %30 : vector<16xf32> to vector<16x1xf32>
    %32 = arith.negf %31 : vector<16x1xf32>
    %33 = math.exp %32 : vector<16x1xf32>
    %cst_27 = arith.constant 1.000000e+00 : f32
    %34 = vector.broadcast %cst_27 : f32 to vector<16x1xf32>
    %35 = arith.addf %34, %33 : vector<16x1xf32>
    %36 = arith.divf %34, %35 : vector<16x1xf32>
    %c0_28 = arith.constant 0 : index
    %c0_29 = arith.constant 0 : index
    %37 = vector.load %arg7[%c0_28, %c0_29] : memref<16x1xf32, #tpu.memory_space<vmem>>, vector<16x1xf32>
    tpu.vector_store %arg7[%c0_28, %c0_29], %36 {strides = array<i32>} : memref<16x1xf32, #tpu.memory_space<vmem>>, vector<16x1xf32>,
    return
  }
  func.func @transform_0(%arg0: i32) -> (i32, i32) {
    %c0_i32 = arith.constant 0 : i32
    %c0_i32_0 = arith.constant 0 : i32
    return %arg0, %c0_i32 : i32, i32
  }
  func.func @transform_1(%arg0: i32) -> (i32, i32) {
    %c0_i32 = arith.constant 0 : i32
    %c0_i32_0 = arith.constant 0 : i32
    %c0_i32_1 = arith.constant 0 : i32
    return %c0_i32, %c0_i32_0 : i32, i32
  }
  func.func @transform_2(%arg0: i32) -> (i32, i32) {
    %c0_i32 = arith.constant 0 : i32
    %c0_i32_0 = arith.constant 0 : i32
    %c0_i32_1 = arith.constant 0 : i32
    return %c0_i32, %c0_i32_0 : i32, i32
  }
  func.func @transform_3(%arg0: i32) -> (i32, i32) {
    %c0_i32 = arith.constant 0 : i32
    %c0_i32_0 = arith.constant 0 : i32
    %c0_i32_1 = arith.constant 0 : i32
    return %c0_i32, %c0_i32_0 : i32, i32
  }
  func.func @transform_4(%arg0: i32) -> (i32, i32) {
    %c0_i32 = arith.constant 0 : i32
    %c0_i32_0 = arith.constant 0 : i32
    %c0_i32_1 = arith.constant 0 : i32
    return %c0_i32, %c0_i32_0 : i32, i32
  }
  func.func @transform_5(%arg0: i32) -> (i32, i32) {
    %c0_i32 = arith.constant 0 : i32
    %c0_i32_0 = arith.constant 0 : i32
    %c0_i32_1 = arith.constant 0 : i32
    return %c0_i32, %c0_i32_0 : i32, i32
  }
  func.func @transform_6(%arg0: i32) -> (i32, i32) {
    %c0_i32 = arith.constant 0 : i32
    %c0_i32_0 = arith.constant 0 : i32
    return %arg0, %c0_i32 : i32, i32
  }
}

</mosaic_0001>

<bundles_post_ra>
// kernel: tpu_custom_call.1
= control target key start
LH: loop header
LB: loop body
LE: loop exit
PB: predicated region body
PF: predicated region fallthrough
CT: control target
= control target key end

     0   :  { %11 = vsyncpa [#allocation4], 0  ;;  %s902_s0 = inlined_call_operand.hbm [shape: f32[16,97], index: 0, kind: input, shape index: {}]   ;;  %s903_s1 = inlined_call_operand.hbm [shape: bf16[128,128], index: 1, kind: input, shape index: {}]   ;;  %s904_s2 = inlined_call_operand.hbm [shape: bf16[128,128], index: 2, kind: input, shape index: {}]   ;;  %s905_s3 = inlined_call_operand.hbm [shape: bf16[128,128], index: 3, kind: input, shape index: {}]   ;;  %s906_s4 = inlined_call_operand.hbm [shape: bf16[128,128], index: 4, kind: input, shape index: {}]   ;;  %s907_s5 = inlined_call_operand.vmem [shape: f32[1,128], index: 5, kind: input, shape index: {}]   ;;  %s908_s6 = inlined_call_operand.vmem [shape: f32[16,1], index: 6, kind: output, shape index: {}]  }
   0x1   :  { %12 = vsyncpa [#allocation6], 0  ;;  %s31_s23 = sshll.u32 %s903_s1, 4  ;;  %s32_s23 = int_to_ptr.hbm [resolvable:$true] %s31_s23 }
   0x2   :  { %13 = vsyncpa [#allocation9], 0  ;;  %s818_s24 = smov [#allocation5]   ;;  %s57_s28 = sshll.u32 %s905_s3, 4  ;;  %s58_s28 = int_to_ptr.hbm [resolvable:$true] %s57_s28 }
   0x3   :  { %s33_s25 = sshll.u32 %s818_s24, 4  ;;  %s819_s29 = smov 64   ;;  %s34_s25 = int_to_ptr.vmem [resolvable:$true] %s33_s25 }
   0x4   :  { %s820_s30 = smov 4   ;;  %s821_s7 = smov [#allocation8]  }
   0x5   :  { %39 = dma.hbm_to_vmem [thread:$0]  %s32_s23, 1024, %s34_s25, [#allocation6], %s819_s29, %s819_s29, %s820_s30  }
   0x6   :  { %s59_s8 = sshll.u32 %s821_s7, 4  ;;  %s18_s10 = sshll.u32 %s902_s0, 4  ;;  %s60_s8 = int_to_ptr.vmem [resolvable:$true] %s59_s8  ;;  %s19_s10 = int_to_ptr.hbm [resolvable:$true] %s18_s10 }
   0x7   :  { %65 = dma.hbm_to_vmem [thread:$0]  %s58_s28, 1024, %s60_s8, [#allocation9], %s819_s29, %s819_s29, %s820_s30  }
   0x8   :  { %s822_s3 = smov [#allocation3]   ;;  %s44_s14 = sshll.u32 %s904_s2, 4  ;;  %s45_s14 = int_to_ptr.hbm [resolvable:$true] %s44_s14 }
   0x9   :  { %s20_s11 = sshll.u32 %s822_s3, 4  ;;  %s823_s15 = smov 128   ;;  %s21_s11 = int_to_ptr.vmem [resolvable:$true] %s20_s11 }
   0xa   :  { %s824_s16 = smov 8   ;;  %s825_s17 = smov [#allocation7]  }
   0xb   :  { %26 = dma.hbm_to_vmem [thread:$0]  %s19_s10, 256, %s21_s11, [#allocation4], %s823_s15, %s823_s15, %s824_s16  }
   0xc   :  { %s46_s18 = sshll.u32 %s825_s17, 4  ;;  %s70_s20 = sshll.u32 %s906_s4, 4  ;;  %s47_s18 = int_to_ptr.vmem [resolvable:$true] %s46_s18  ;;  %s71_s20 = int_to_ptr.hbm [resolvable:$true] %s70_s20 }
   0xd   :  { %52 = dma.hbm_to_vmem [thread:$0]  %s45_s14, 1024, %s47_s18, [#allocation6], %s819_s29, %s819_s29, %s820_s30  }
   0xe   :  { %s826_s21 = smov [#allocation10]  }
   0xf   :  { %s72_s22 = sshll.u32 %s826_s21, 4  ;;  %s73_s22 = int_to_ptr.vmem [resolvable:$true] %s72_s22 }
  0x10   :  { %78 = dma.hbm_to_vmem [thread:$0]  %s71_s20, 1024, %s73_s22, [#allocation9], %s819_s29, %s819_s29, %s820_s30  }
  0x11   :  { %812 = dma.done.wait [#allocation4], 256  }
  0x12   :  { %813 = vsyncadd [#allocation4], 4294967040 }
  0x13   :  { %814 = dma.done.wait [#allocation6], 2048  }
  0x14   :  { %815 = vsyncadd [#allocation6], 4294965248 }
  0x15   :  { %816 = dma.done.wait [#allocation9], 2048  }
  0x16   :  { %817 = vsyncadd [#allocation9], 4294965248  ;;  %vm103_vm0 = vcmask 1044232   ;;  %vm106_vm1 = vcmask 1044472   ;;  %v827_v0 = vmov 0   ;;  %v647_v2 = vld [vmem:[#allocation5 + $0x38] sm:$0xff] }
  0x17   :  { %104 = vst.msk [vmem:[#allocation2] sm:$0xf] %vm103_vm0, %v827_v0  ;;  %v828_v1 = vmov 1065369472   ;;  %188 = vmatpush.bf16.msra.mxu0 %v647_v2  ;;  %v646_v3 = vld [vmem:[#allocation5 + $0x30] sm:$0xff]  ;;  %vm113_vm2 = vcmask 789504  }
  0x18   :  { %105 = vst.msk [vmem:[#allocation2 + $0x4] sm:$0xf] %vm103_vm0, %v827_v0  ;;  %v109_v4 = vld [vmem:[#allocation3] sm:$0xff]  ;;  %v110_v5 = vld [vmem:[#allocation3 + $0x8] sm:$0xff]  ;;  %v645_v10 = vld [vmem:[#allocation5 + $0x28] sm:$0xff]  ;;  %vm495_vm5 = vcmask 7168  }
  0x19   :  { %107 = vst.msk [vmem:[#allocation2] sm:$0xf] %vm106_vm1, %v828_v1  ;;  %v111_v6 = vpack.c.bf16 %v109_v4, %v109_v4  ;;  %v655_v7 = vld [vmem:[#allocation7 + $0x38] sm:$0xff]  ;;  %v112_v8 = vpack.c.bf16 %v110_v5, %v110_v5  ;;  %v654_v9 = vld [vmem:[#allocation7 + $0x30] sm:$0xff]  ;;  %v653_v11 = vld [vmem:[#allocation7 + $0x28] sm:$0xff] }
  0x1a   :  { %108 = vst.msk [vmem:[#allocation2 + $0x4] sm:$0xf] %vm106_vm1, %v828_v1  ;;  %269 = vmatpush.bf16.msra.mxu1 %v655_v7  ;;  %v644_v12 = vld [vmem:[#allocation5 + $0x20] sm:$0xff]  ;;  %v643_v14 = vld [vmem:[#allocation5 + $0x18] sm:$0xff]  ;;  %v642_v16 = vld [vmem:[#allocation5 + $0x10] sm:$0xff] }
  0x1b   :  { %114 = vst.msk [vmem:[#allocation2] sm:$0xf] %vm113_vm2, %v111_v6  ;;  %189 = vmatpush.bf16.msra.mxu0 %v646_v3  ;;  %v652_v13 = vld [vmem:[#allocation7 + $0x20] sm:$0xff]  ;;  %v651_v15 = vld [vmem:[#allocation7 + $0x18] sm:$0xff]  ;;  %v641_v17 = vld [vmem:[#allocation5 + $0x8] sm:$0xff] }
  0x1c   :  { %115 = vst.msk [vmem:[#allocation2 + $0x4] sm:$0xf] %vm113_vm2, %v112_v8  ;;  %v640_v18 = vld [vmem:[#allocation5] sm:$0xff]  ;;  %v650_v20 = vld [vmem:[#allocation7 + $0x10] sm:$0xff]  ;;  %v649_v21 = vld [vmem:[#allocation7 + $0x8] sm:$0xff] }
  0x1d   :  { %v648_v22 = vld [vmem:[#allocation7] sm:$0xff]  ;;  %v663_v23 = vld [vmem:[#allocation8 + $0x38] sm:$0xff]  ;;  %v662_v24 = vld [vmem:[#allocation8 + $0x30] sm:$0xff] }
  0x1e   :  { %270 = vmatpush.bf16.msra.mxu1 %v654_v9  ;;  %350 = vmatpush.bf16.msra.mxu2 %v663_v23  ;;  %v661_v25 = vld [vmem:[#allocation8 + $0x28] sm:$0xff]  ;;  %v660_v26 = vld [vmem:[#allocation8 + $0x20] sm:$0xff]  ;;  %v659_v27 = vld [vmem:[#allocation8 + $0x18] sm:$0xff] }
  0x1f   :  { %190 = vmatpush.bf16.msra.mxu0 %v645_v10  ;;  %v658_v33 = vld [vmem:[#allocation8 + $0x10] sm:$0xff]  ;;  %v657_v34 = vld [vmem:[#allocation8 + $0x8] sm:$0xff]  ;;  %v656_v35 = vld [vmem:[#allocation8] sm:$0xff] }
  0x20   :  { %v671_v36 = vld [vmem:[#allocation10 + $0x38] sm:$0xff]  ;;  %v670_v37 = vld [vmem:[#allocation10 + $0x30] sm:$0xff]  ;;  %v669_v38 = vld [vmem:[#allocation10 + $0x28] sm:$0xff] }
  0x21   :  { %431 = vmatpush.bf16.msra.mxu3 %v671_v36  ;;  %v668_v39 = vld [vmem:[#allocation10 + $0x20] sm:$0xff]  ;;  %v667_v40 = vld [vmem:[#allocation10 + $0x18] sm:$0xff]  ;;  %v666_v46 = vld [vmem:[#allocation10 + $0x10] sm:$0xff] }
  0x22   :  { %271 = vmatpush.bf16.msra.mxu1 %v653_v11  ;;  %351 = vmatpush.bf16.msra.mxu2 %v662_v24  ;;  %v665_v47 = vld [vmem:[#allocation10 + $0x8] sm:$0xff]  ;;  %v664_v48 = vld [vmem:[#allocation10] sm:$0xff] }
  0x23   :  { %191 = vmatpush.bf16.msra.mxu0 %v644_v12  ;;  %v639_v19 = vld [vmem:[#allocation2] sm:$0xff] }
  0x24   :  { %v683_v54 = vld [vmem:[%s907_s5] ss:$0 sm:$0xff] }
  0x25   :  { %432 = vmatpush.bf16.msra.mxu3 %v670_v37 }
  0x26   :  { %272 = vmatpush.bf16.msra.mxu1 %v652_v13  ;;  %352 = vmatpush.bf16.msra.mxu2 %v661_v25 }
  0x27   :  { %192 = vmatpush.bf16.msra.mxu0 %v643_v14 }
  0x29   :  { %433 = vmatpush.bf16.msra.mxu3 %v669_v38 }
  0x2a   :  { %273 = vmatpush.bf16.msra.mxu1 %v651_v15  ;;  %353 = vmatpush.bf16.msra.mxu2 %v660_v26 }
  0x2b   :  { %193 = vmatpush.bf16.msra.mxu0 %v642_v16 }
  0x2d   :  { %434 = vmatpush.bf16.msra.mxu3 %v668_v39 }
  0x2e   :  { %274 = vmatpush.bf16.msra.mxu1 %v650_v20  ;;  %354 = vmatpush.bf16.msra.mxu2 %v659_v27 }
  0x2f   :  { %194 = vmatpush.bf16.msra.mxu0 %v641_v17 }
  0x31   :  { %435 = vmatpush.bf16.msra.mxu3 %v667_v40 }
  0x32   :  { %275 = vmatpush.bf16.msra.mxu1 %v649_v21  ;;  %355 = vmatpush.bf16.msra.mxu2 %v658_v33 }
  0x33   :  { %195 = vmatpush.bf16.msra.mxu0 %v640_v18 }
  0x35   :  { %436 = vmatpush.bf16.msra.mxu3 %v666_v46 }
  0x36   :  { %196 = vmatmul.bf16.vlgmr.msra.gmra.mxu0 %v639_v19  ;;  %276 = vmatpush.bf16.msra.mxu1 %v648_v22 }
  0x37   :  { %356 = vmatpush.bf16.msra.mxu2 %v657_v34 }
  0x39   :  { %437 = vmatpush.bf16.msra.mxu3 %v665_v47 }
  0x3b   :  { %357 = vmatpush.bf16.msra.mxu2 %v656_v35 }
  0x3d   :  { %438 = vmatpush.bf16.msra.mxu3 %v664_v48 }
  0xb3   :  { %v197_v28 = vpop.f32.mrf.mxu0 }
  0xb4   :  { %v202_v30 = vmax.f32 %v197_v28, 0.0 }
  0xbb   :  { %v199_v29 = vpop.f32.mrf.mxu0 }
  0xbc   :  { %v203_v31 = vmax.f32 %v199_v29, 0.0 }
  0xbe   :  { %v204_v32 = vpack.c.bf16 %v203_v31, %v202_v30 }
  0xc0   :  { %277 = vmatmul.bf16.vlgmr.msra.gmra.mxu1 %v204_v32 }
 0x13d   :  { %v278_v41 = vpop.f32.mrf.mxu1 }
 0x13e   :  { %v283_v43 = vmax.f32 %v278_v41, 0.0 }
 0x145   :  { %v280_v42 = vpop.f32.mrf.mxu1 }
 0x146   :  { %v284_v44 = vmax.f32 %v280_v42, 0.0 }
 0x148   :  { %v285_v45 = vpack.c.bf16 %v284_v44, %v283_v43 }
 0x14a   :  { %358 = vmatmul.bf16.vlgmr.msra.gmra.mxu2 %v285_v45 }
 0x1cd   :  { %v359_v49 = vpop.f32.mrf.mxu2 }
 0x1ce   :  { %v364_v51 = vmax.f32 %v359_v49, 0.0 }
 0x1d5   :  { %v361_v50 = vpop.f32.mrf.mxu2 }
 0x1d6   :  { %v365_v52 = vmax.f32 %v361_v50, 0.0 }
 0x1d8   :  { %v366_v53 = vpack.c.bf16 %v365_v52, %v364_v51 }
 0x1da   :  { %439 = vmatmul.bf16.vlgmr.msra.gmra.mxu3 %v366_v53 }
 0x25d   :  { %v440_v55 = vpop.f32.mrf.mxu3 }
 0x25e   :  { %v445_v56 = vmax.f32 %v440_v55, 0.0 }
 0x260   :  { %v451_v57 = vmul.f32 %v683_v54, %v445_v56 }
 0x262   :  { %453 = vadd.xlane.f32.xlu0 %v451_v57 }
 0x265   :  { %v442_v58 = vpop.f32.mrf.mxu3 }
 0x266   :  { %v446_v59 = vmax.f32 %v442_v58, 0.0 }
 0x268   :  { %v452_v60 = vmul.f32 %v683_v54, %v446_v59 }
 0x26a   :  { %455 = vadd.xlane.f32.xlu0 %v452_v60 }
 0x2d5   :  { %v454_v61 = vpop.xlane.xlu0 %453 }
 0x2d6   :  { %v637_v62 = vmul.f32 -1.442695, %v454_v61 }
 0x2d8   :  { %684 = vpow2.f32 %v637_v62 }
 0x2dd   :  { %v456_v63 = vpop.xlane.xlu0 %455 }
 0x2de   :  { %v685_v0 = vpop.eup %684  ;;  %v638_v1 = vmul.f32 -1.442695, %v456_v63 }
 0x2df   :  { %v463_v2 = vadd.f32 1.0, %v685_v0 }
 0x2e0   :  { %686 = vpow2.f32 %v638_v1 }
 0x2e1   :  { %688 = vrcp.f32 %v463_v2  ;;  %v476_v8 = vand.u32 2147483648, %v463_v2  ;;  %v474_v10 = vand.u32 2147483647, %v463_v2  ;;  %vm470_vm4 = vweird.f32 %v463_v2 }
 0x2e3   :  { %v477_v13 = vor.u32 1.1754944e-38, %v476_v8  ;;  %vm475_vm7 = vcmp.eq.f32.partialorder %v474_v10, 8.507059e+37 }
 0x2e6   :  { %v687_v3 = vpop.eup %686 }
 0x2e7   :  { %v689_v4 = vpop.eup %688  ;;  %v464_v5 = vadd.f32 1.0, %v687_v3 }
 0x2e8   :  { %v466_v6 = vmul.f32 %v689_v4, %v463_v2  ;;  %vm471_vm3 = vweird.f32 %v689_v4 }
 0x2e9   :  { %690 = vrcp.f32 %v464_v5  ;;  %vm472_vm6 = vmor %vm470_vm4, %vm471_vm3  ;;  %v491_v18 = vand.u32 2147483648, %v464_v5  ;;  %v489_v20 = vand.u32 2147483647, %v464_v5  ;;  %vm485_vm9 = vweird.f32 %v464_v5 }
 0x2ea   :  { %v467_v7 = vsub.f32 1.0, %v466_v6 }
 0x2eb   :  { %v492_v22 = vor.u32 1.1754944e-38, %v491_v18  ;;  %vm490_vm11 = vcmp.eq.f32.partialorder %v489_v20, 8.507059e+37 }
 0x2ec   :  { %v468_v9 = vmul.f32 %v689_v4, %v467_v7 }
 0x2ee   :  { %v469_v11 = vadd.f32 %v689_v4, %v468_v9 }
 0x2ef   :  { %v691_v12 = vpop.eup %690 }
 0x2f0   :  { %v473_v14 = vsel %vm472_vm6, %v689_v4, %v469_v11  ;;  %v481_v15 = vmul.f32 %v691_v12, %v464_v5  ;;  %vm486_vm8 = vweird.f32 %v691_v12 }
 0x2f1   :  { %v478_v16 = vsel %vm475_vm7, %v477_v13, %v473_v14  ;;  %vm487_vm10 = vmor %vm485_vm9, %vm486_vm8 }
 0x2f2   :  { %496 = vst.msk [vmem:[%s908_s6] sm:$0xff] %vm495_vm5, %v478_v16  ;;  %v482_v17 = vsub.f32 1.0, %v481_v15 }
 0x2f4   :  { %v483_v19 = vmul.f32 %v691_v12, %v482_v17 }
 0x2f6   :  { %v484_v21 = vadd.f32 %v691_v12, %v483_v19 }
 0x2f8   :  { %v488_v23 = vsel %vm487_vm10, %v691_v12, %v484_v21 }
 0x2f9   :  { %v493_v24 = vsel %vm490_vm11, %v492_v22, %v488_v23 }
 0x2fa   :  { %497 = vst.msk [vmem:[%s908_s6 + $0x8] sm:$0xff] %vm495_vm5, %v493_v24 }
 0x2fb   :  { %502 = vsyncpa [#allocation4], 1 }
 0x2fc   :  { %503 = vsyncpa [#allocation6], 1 }
 0x2fd   :  { %504 = vsyncpa [#allocation9], 1 }

</bundles_post_ra>
